<compile_context>
chip_gen: v7x
topology: tpu7x:2x2x1
jax: 0.10.0
libtpu: 0.0.40
codegen_flags: <defaults>
</compile_context>

<pallas_src>
import functools

import jax
import jax.numpy as jnp
from jax.experimental import pallas as pl
from jax.experimental.pallas import tpu as pltpu


def _round_up(x, m):
    return ((x + m - 1) // m) * m


def branchnet_kernel(u_t_ref, w1_ref, b1_ref, w2_ref, b2_ref, o_t_ref):
    # u_t: (input_dim, bm) bf16, batch on lanes.
    # w1 : (hidden_dim, input_dim) bf16   (PyTorch nn.Linear layout)
    # w2 : (latent_dim, hidden_dim) bf16
    # b1 : (hidden_dim, 1) f32, b2: (latent_dim, 1) f32
    h = jnp.dot(w1_ref[...], u_t_ref[...],
                preferred_element_type=jnp.float32)          # (hidden, bm) f32 acc
    h = jnp.tanh(h + b1_ref[...])                             # f32 VPU/EUP, full lanes
    out = jnp.dot(w2_ref[...], h.astype(w2_ref.dtype),
                  preferred_element_type=jnp.float32)         # (latent, bm) f32 acc
    o_t_ref[...] = (out + b2_ref[...]).astype(o_t_ref.dtype)  # lane-dense store


def _choose_block_batch(B, input_dim, hidden_dim, latent_dim,
                        compute_itemsize, out_itemsize,
                        *, target=1024, vmem_budget_bytes=8 * 1024 * 1024):
    """Largest lane-aligned batch tile under a conservative per-step VMEM budget."""
    # Per-row VMEM bytes in one grid step: double-buffered u/out streams +
    # single-buffered hidden intermediates (f32 + bf16 copy). Weights are tiny.
    per_row = (2 * input_dim * compute_itemsize
               + 2 * latent_dim * out_itemsize
               + hidden_dim * (4 + compute_itemsize))
    cap = max(128, (vmem_budget_bytes // per_row) // 128 * 128)
    return int(min(target, cap, _round_up(max(B, 1), 128)))


def _io_spec(block_shape, index_map, buffer_count):
    if buffer_count is not None and buffer_count != 2:
        return pl.BlockSpec(block_shape, index_map,
                            pipeline_mode=pl.Buffered(buffer_count))
    return pl.BlockSpec(block_shape, index_map)


def branchnet_forward_t(u_t, w1, b1, w2, b2, *, block_batch=None,
                        compute_dtype=jnp.bfloat16, out_dtype=jnp.float32,
                        buffer_count=2):
    """Lane-dense core: u_t is (input_dim, B) with batch on lanes.

    Returns (latent_dim, B_pad) where B_pad = round_up(B, block_batch);
    padded columns (if any) contain junk derived from zero inputs.
    """
    input_dim, B = u_t.shape
    hidden_dim, in_dim_w = w1.shape
    latent_dim, hid_w = w2.shape
    assert in_dim_w == input_dim and hid_w == hidden_dim

    c_itemsize = jnp.dtype(compute_dtype).itemsize
    o_itemsize = jnp.dtype(out_dtype).itemsize
    if block_batch is None:
        block_batch = _choose_block_batch(B, input_dim, hidden_dim, latent_dim,
                                          c_itemsize, o_itemsize)
    # Lane-axis tiling rule: tile must be a multiple of 128 or the full extent.
    assert block_batch == B or block_batch % 128 == 0, (
        f"block_batch={block_batch} must be a multiple of 128 (or equal B={B})")

    B_pad = _round_up(B, block_batch)
    if B_pad != B:
        u_t = jnp.pad(u_t, ((0, 0), (0, B_pad - B)))

    u_c = u_t.astype(compute_dtype)
    w1_c = w1.astype(compute_dtype)
    w2_c = w2.astype(compute_dtype)
    b1_c = b1.reshape(hidden_dim, 1).astype(jnp.float32)
    b2_c = b2.reshape(latent_dim, 1).astype(jnp.float32)

    grid = (B_pad // block_batch,)

    return pl.pallas_call(
        branchnet_kernel,
        out_shape=jax.ShapeDtypeStruct((latent_dim, B_pad), out_dtype),
        grid_spec=pltpu.PrefetchScalarGridSpec(
            num_scalar_prefetch=0,
            grid=grid,
            in_specs=[
                _io_spec((input_dim, block_batch), lambda i: (0, i), buffer_count),
                # Weights/biases: constant-indexed, stay resident in VMEM.
                pl.BlockSpec((hidden_dim, input_dim), lambda i: (0, 0)),
                pl.BlockSpec((hidden_dim, 1), lambda i: (0, 0)),
                pl.BlockSpec((latent_dim, hidden_dim), lambda i: (0, 0)),
                pl.BlockSpec((latent_dim, 1), lambda i: (0, 0)),
            ],
            out_specs=_io_spec((latent_dim, block_batch), lambda i: (0, i),
                               buffer_count),
        ),
        compiler_params=pltpu.CompilerParams(
            dimension_semantics=("parallel",)),  # megacore-shard the batch grid
    )(u_c, w1_c, b1_c, w2_c, b2_c)


def branchnet_forward(u, w1, b1, w2, b2, *, block_batch=None,
                      compute_dtype=jnp.bfloat16, buffer_count=2):
    """PyTorch-layout entry point.

    u : (B, input_dim) float32
    w1: (hidden_dim, input_dim), b1: (hidden_dim,)   -- nn.Linear layout
    w2: (latent_dim, hidden_dim), b2: (latent_dim,)
    returns (B, latent_dim) float32.

    The transposes below are layout plumbing to present batch on the lane axis;
    callers that can produce/consume transposed activations should use
    branchnet_forward_t directly and skip them.
    """
    B, _ = u.shape
    latent_dim = w2.shape[0]
    out_t = branchnet_forward_t(u.T, w1, b1, w2, b2,
                                block_batch=block_batch,
                                compute_dtype=compute_dtype,
                                out_dtype=u.dtype,
                                buffer_count=buffer_count)
    return out_t[:, :B].T  # (B, latent_dim)


def init_params(key, input_dim, latent_dim, hidden_dim=64, dtype=jnp.float32):
    # PyTorch-nn.Linear-like uniform init, native (out_features, in_features) layout.
    k1, k2, k3, k4 = jax.random.split(key, 4)
    bound1 = 1.0 / jnp.sqrt(input_dim)
    bound2 = 1.0 / jnp.sqrt(hidden_dim)
    w1 = jax.random.uniform(k1, (hidden_dim, input_dim), dtype, -bound1, bound1)
    b1 = jax.random.uniform(k2, (hidden_dim,), dtype, -bound1, bound1)
    w2 = jax.random.uniform(k3, (latent_dim, hidden_dim), dtype, -bound2, bound2)
    b2 = jax.random.uniform(k4, (latent_dim,), dtype, -bound2, bound2)
    return w1, b1, w2, b2


if __name__ == "__main__":
    # Small shapes consistent with the module: batch=8, input_dim=16,
    # hidden_dim=64 (module default), latent_dim=32.
    batch, input_dim, hidden_dim, latent_dim = 8, 16, 64, 32

    key = jax.random.PRNGKey(0)
    k_u, k_p = jax.random.split(key)
    u = jax.random.normal(k_u, (batch, input_dim), dtype=jnp.float32)
    w1, b1, w2, b2 = init_params(k_p, input_dim, latent_dim, hidden_dim)

    out = branchnet_forward(u, w1, b1, w2, b2)
    out = jax.block_until_ready(out)
    assert out.shape == (batch, latent_dim)

    # Reference: same math in f32 on bf16-cast operands (matches the kernel's
    # bf16-storage / f32-accumulation numerics).
    u_r = u.astype(jnp.bfloat16).astype(jnp.float32)
    w1_r = w1.astype(jnp.bfloat16).astype(jnp.float32)
    w2_r = w2.astype(jnp.bfloat16).astype(jnp.float32)
    hp = jax.lax.Precision.HIGHEST
    ref = jnp.dot(jnp.tanh(jnp.dot(u_r, w1_r.T, precision=hp) + b1),
                  w2_r.T, precision=hp) + b2
    assert jnp.allclose(out, ref, atol=5e-3, rtol=5e-3), (
        float(jnp.max(jnp.abs(out - ref))))

    print("KERNEL_OK")
</pallas_src>

<mosaic_0001>
module attributes {stable_mosaic.version = 11 : i64} {
  func.func @branchnet_kernel(%arg0: i32, %arg1: memref<16x128xbf16, #tpu.memory_space<vmem>>, %arg2: memref<64x16xbf16, #tpu.memory_space<vmem>>, %arg3: memref<64x1xf32, #tpu.memory_space<vmem>>, %arg4: memref<32x64xbf16, #tpu.memory_space<vmem>>, %arg5: memref<32x1xf32, #tpu.memory_space<vmem>>, %arg6: memref<32x128xf32, #tpu.memory_space<vmem>>) attributes {dimension_semantics = [#tpu.dimension_semantics<parallel>], iteration_bounds = array<i64: 1>, scalar_prefetch = 0 : i64, scratch_operands = 0 : i64, tpu.core_type = #tpu.core_type<tc>, window_params = [{transform_indices = @transform_0, window_bounds = array<i64: 16, 128>}, {pipeline_mode = #tpu.pipeline_mode<synchronous>, transform_indices = @transform_1, window_bounds = array<i64: 64, 16>}, {pipeline_mode = #tpu.pipeline_mode<synchronous>, transform_indices = @transform_2, window_bounds = array<i64: 64, 1>}, {pipeline_mode = #tpu.pipeline_mode<synchronous>, transform_indices = @transform_3, window_bounds = array<i64: 32, 64>}, {pipeline_mode = #tpu.pipeline_mode<synchronous>, transform_indices = @transform_4, window_bounds = array<i64: 32, 1>}, {transform_indices = @transform_5, window_bounds = array<i64: 32, 128>}]} {
    %c0 = arith.constant 0 : index
    %c0_0 = arith.constant 0 : index
    %0 = vector.load %arg2[%c0, %c0_0] : memref<64x16xbf16, #tpu.memory_space<vmem>>, vector<64x16xbf16>
    %c0_1 = arith.constant 0 : index
    %c0_2 = arith.constant 0 : index
    %1 = vector.load %arg1[%c0_1, %c0_2] : memref<16x128xbf16, #tpu.memory_space<vmem>>, vector<16x128xbf16>
    %cst = arith.constant dense<0.000000e+00> : vector<64x128xf32>
    %2 = tpu.matmul %0, %1, %cst {dimension_numbers = #tpu.dot_dimension_numbers<[1], [0], [0], [1], [0, 0, 1, 1], [], []>} : vector<64x16xbf16>, vector<16x128xbf16>, vector<64x128xf32> -> vector<64x128xf32>
    %c0_3 = arith.constant 0 : index
    %c0_4 = arith.constant 0 : index
    %3 = vector.load %arg3[%c0_3, %c0_4] : memref<64x1xf32, #tpu.memory_space<vmem>>, vector<64x1xf32>
    %4 = vector.broadcast %3 : vector<64x1xf32> to vector<64x128xf32>
    %5 = arith.addf %2, %4 : vector<64x128xf32>
    %6 = math.tanh %5 : vector<64x128xf32>
    %c0_5 = arith.constant 0 : index
    %c0_6 = arith.constant 0 : index
    %7 = vector.load %arg4[%c0_5, %c0_6] : memref<32x64xbf16, #tpu.memory_space<vmem>>, vector<32x64xbf16>
    %8 = arith.truncf %6 : vector<64x128xf32> to vector<64x128xbf16>
    %cst_7 = arith.constant dense<0.000000e+00> : vector<32x128xf32>
    %9 = tpu.matmul %7, %8, %cst_7 {dimension_numbers = #tpu.dot_dimension_numbers<[1], [0], [0], [1], [0, 0, 1, 1], [], []>} : vector<32x64xbf16>, vector<64x128xbf16>, vector<32x128xf32> -> vector<32x128xf32>
    %c0_8 = arith.constant 0 : index
    %c0_9 = arith.constant 0 : index
    %10 = vector.load %arg5[%c0_8, %c0_9] : memref<32x1xf32, #tpu.memory_space<vmem>>, vector<32x1xf32>
    %11 = vector.broadcast %10 : vector<32x1xf32> to vector<32x128xf32>
    %12 = arith.addf %9, %11 : vector<32x128xf32>
    %c0_10 = arith.constant 0 : index
    %c0_11 = arith.constant 0 : index
    %13 = vector.load %arg6[%c0_10, %c0_11] : memref<32x128xf32, #tpu.memory_space<vmem>>, vector<32x128xf32>
    tpu.vector_store %arg6[%c0_10, %c0_11], %12 {strides = array<i32>} : memref<32x128xf32, #tpu.memory_space<vmem>>, vector<32x128xf32>,
    return
  }
  func.func @transform_0(%arg0: i32) -> (i32, i32) {
    %c0_i32 = arith.constant 0 : i32
    %c0_i32_0 = arith.constant 0 : i32
    return %c0_i32, %arg0 : i32, i32
  }
  func.func @transform_1(%arg0: i32) -> (i32, i32) {
    %c0_i32 = arith.constant 0 : i32
    %c0_i32_0 = arith.constant 0 : i32
    %c0_i32_1 = arith.constant 0 : i32
    return %c0_i32, %c0_i32_0 : i32, i32
  }
  func.func @transform_2(%arg0: i32) -> (i32, i32) {
    %c0_i32 = arith.constant 0 : i32
    %c0_i32_0 = arith.constant 0 : i32
    %c0_i32_1 = arith.constant 0 : i32
    return %c0_i32, %c0_i32_0 : i32, i32
  }
  func.func @transform_3(%arg0: i32) -> (i32, i32) {
    %c0_i32 = arith.constant 0 : i32
    %c0_i32_0 = arith.constant 0 : i32
    %c0_i32_1 = arith.constant 0 : i32
    return %c0_i32, %c0_i32_0 : i32, i32
  }
  func.func @transform_4(%arg0: i32) -> (i32, i32) {
    %c0_i32 = arith.constant 0 : i32
    %c0_i32_0 = arith.constant 0 : i32
    %c0_i32_1 = arith.constant 0 : i32
    return %c0_i32, %c0_i32_0 : i32, i32
  }
  func.func @transform_5(%arg0: i32) -> (i32, i32) {
    %c0_i32 = arith.constant 0 : i32
    %c0_i32_0 = arith.constant 0 : i32
    return %c0_i32, %arg0 : i32, i32
  }
}

</mosaic_0001>

<bundles_post_ra>
// kernel: tpu_custom_call.1
= control target key start
LH: loop header
LB: loop body
LE: loop exit
PB: predicated region body
PF: predicated region fallthrough
CT: control target
= control target key end

     0   :  { %vm106_vm0 = vcmask 130048   ;;  %v409_v3 = vmov 0   ;;  %s518_s0 = inlined_call_operand.vmem [shape: bf16[16,128], index: 0, kind: input, shape index: {}]   ;;  %s519_s1 = inlined_call_operand.vmem [shape: bf16[64,16], index: 1, kind: input, shape index: {}]   ;;  %s520_s2 = inlined_call_operand.vmem [shape: f32[64,1], index: 2, kind: input, shape index: {}]   ;;  %s521_s3 = inlined_call_operand.vmem [shape: bf16[32,64], index: 3, kind: input, shape index: {}]   ;;  %s522_s4 = inlined_call_operand.vmem [shape: f32[32,1], index: 4, kind: input, shape index: {}]   ;;  %s523_s5 = inlined_call_operand.hbm [shape: f32[32,128], index: 5, kind: output, shape index: {}]  }
   0x1   :  { %v362_v0 = vld [vmem:[%s518_s0] sm:$0xff]   ;;  %v364_v2 = vld [vmem:[%s519_s1 + $0x8] sm:$0xff]   ;;  %360 = vset.pattern.permute.xlu0 %v409_v3  ;;  %v365_v4 = vld [vmem:[%s519_s1 + $0x10] sm:$0xff]   ;;  %361 = vset.pattern.permute.xlu1 %v409_v3 }
   0x2   :  { %v363_v1 = vld [vmem:[%s519_s1] sm:$0xff]   ;;  %334 = vmatprep.subr.bf16.mxu0 %v362_v0  ;;  %v34_v6 = vld [vmem:[%s520_s2 + $0x10] sm:$0xff]  ;;  %v33_v7 = vld [vmem:[%s520_s2 + $0x8] sm:$0xff] }
   0x3   :  { %335 = vmatpush3.bf16.msra.mxu0 %v362_v0  ;;  %336 = vmatprep.mubr.msk.bf16.mxu0 %vm106_vm0, %v363_v1  ;;  %v32_v5 = vld [vmem:[%s520_s2] sm:$0xff]  ;;  %v35_v8 = vld [vmem:[%s520_s2 + $0x18] sm:$0xff] }
   0x4   :  { %42 = vperm.xlu0 %360, %v32_v5   ;;  %52 = vperm.xlu1 %361, %v34_v6   ;;  %v366_v9 = vld [vmem:[%s519_s1 + $0x18] sm:$0xff]  }
   0x6   :  { %337 = vmatmul.mubr.msk.bf16.vlgmr.msra.gmra.mrb[0].mxu0 %vm106_vm0, %v364_v2 }
   0x7   :  { %340 = vmatprep.mubr.msk.bf16.mxu0 %vm106_vm0, %v365_v4 }
   0x8   :  { %47 = vperm.xlu0 %360, %v33_v7  }
   0x9   :  { %10 = vsyncpa [#allocation3], 0  ;;  %57 = vperm.xlu1 %361, %v35_v8   ;;  %v36_v10 = vld [vmem:[%s520_s2 + $0x20] sm:$0xff]  ;;  %v37_v11 = vld [vmem:[%s520_s2 + $0x28] sm:$0xff]  ;;  %vm234_vm1 = vcmask 523264   ;;  %s410_s26 = smov [#allocation2]  }
   0xa   :  { %v38_v12 = vld [vmem:[%s520_s2 + $0x30] sm:$0xff]  ;;  %v39_v13 = vld [vmem:[%s520_s2 + $0x38] sm:$0xff]  ;;  %v200_v14 = vld [vmem:[%s522_s4] sm:$0xff]  ;;  %s299_s27 = sshll.u32 %s410_s26, 4  ;;  %s300_s27 = int_to_ptr.vmem [resolvable:$true] %s299_s27 }
   0xb   :  { %v201_v15 = vld [vmem:[%s522_s4 + $0x8] sm:$0xff]  ;;  %v202_v16 = vld [vmem:[%s522_s4 + $0x10] sm:$0xff]  ;;  %v203_v17 = vld [vmem:[%s522_s4 + $0x18] sm:$0xff]  ;;  %p390_p1 = scmp.lt.s32.totalorder %s300_s27, %s300_s27 }
   0xc   :  { %62 = vperm.xlu0 %360, %v36_v10   ;;  %v367_v18 = vld [vmem:[%s521_s3] sm:$0xff]   ;;  %v368_v55 = vld [vmem:[%s521_s3 + $0x8] sm:$0xff]   ;;  %s385_s3 = scalar_lea.vmem %s300_s27, 512 }
   0xd   :  { %67 = vperm.xlu1 %361, %v37_v11   ;;  %352 = vmatprep.mubr.msk.bf16.mxu1 %vm234_vm1, %v367_v18  ;;  %p386_p0 = scmp.ne.s32.totalorder %s300_s27, %s385_s3  ;;  %p391_p2 = scmp.lt.s32.totalorder %s385_s3, %s385_s3 }
   0xe   :  { %341 = vmatmul.mubr.msk.bf16.gmra.mrb[4].mxu0 %vm106_vm0, %v366_v9 }
   0xf   :  { %p392_p3 = por %p391_p2, %p390_p1 }
  0x10   :  { %72 = vperm.xlu0 %360, %v38_v12  }
  0x11   :  { %77 = vperm.xlu1 %361, %v39_v13   ;;  %p393_p4 = pnand %p392_p3, %p386_p0 }
  0x14   :  { %206 = vperm.xlu0 %360, %v200_v14  }
  0x15   :  { %211 = vperm.xlu1 %361, %v201_v15  }
  0x18   :  { %216 = vperm.xlu0 %360, %v202_v16  }
  0x19   :  { %221 = vperm.xlu1 %361, %v203_v17  }
  0x83   :  { %v43_v19 = vpop.permute.xlu0 %42  ;;  %v53_v20 = vpop.permute.xlu1 %52 }
  0x87   :  { %v48_v21 = vpop.permute.xlu0 %47 }
  0x88   :  { %v58_v22 = vpop.permute.xlu1 %57 }
  0x8b   :  { %v63_v26 = vpop.permute.xlu0 %62 }
  0x8c   :  { %v68_v31 = vpop.permute.xlu1 %67 }
  0x8f   :  { %v73_v33 = vpop.permute.xlu0 %72 }
  0x90   :  { %v78_v37 = vpop.permute.xlu1 %77 }
  0x93   :  { %v207_v56 = vpop.permute.xlu0 %206 }
  0x94   :  { %v212_v57 = vpop.permute.xlu1 %211 }
  0x97   :  { %v217_v58 = vpop.permute.xlu0 %216 }
  0x98   :  { %v222_v62 = vpop.permute.xlu1 %221 }
  0xd9   :  { %v338_v23 = vpop.f32.mrb[0].mxu0 }
  0xda   :  { %v162_v24 = vadd.f32 %v338_v23, %v53_v20  ;;  %v153_v25 = vpop.f32.mrb[1].mxu0 }
  0xdb   :  { %v154_v27 = vadd.f32 %v153_v25, %v43_v19  ;;  %v339_v28 = vpop.f32.mrb[2].mxu0 }
  0xdc   :  { %369 = vtanh.f32 %v162_v24  ;;  %v165_v29 = vadd.f32 %v339_v28, %v58_v22  ;;  %v156_v30 = vpop.f32.mrb[3].mxu0 }
  0xdd   :  { %371 = vtanh.f32 %v154_v27  ;;  %v157_v32 = vadd.f32 %v156_v30, %v48_v21 }
  0xde   :  { %373 = vtanh.f32 %v165_v29 }
  0xdf   :  { %375 = vtanh.f32 %v157_v32 }
  0xe1   :  { %v342_v34 = vpop.f32.mrb[4].mxu0 }
  0xe2   :  { %v178_v35 = vadd.f32 %v342_v34, %v73_v33  ;;  %v169_v36 = vpop.f32.mrb[5].mxu0 }
  0xe3   :  { %v170_v38 = vadd.f32 %v169_v36, %v63_v26  ;;  %v343_v39 = vpop.f32.mrb[6].mxu0 }
  0xe4   :  { %377 = vtanh.f32 %v178_v35  ;;  %v181_v40 = vadd.f32 %v343_v39, %v78_v37  ;;  %v172_v41 = vpop.f32.mrb[7].mxu0 }
  0xe5   :  { %379 = vtanh.f32 %v170_v38  ;;  %v173_v42 = vadd.f32 %v172_v41, %v68_v31 }
  0xe6   :  { %v370_v43 = vpop.eup %369  ;;  %381 = vtanh.f32 %v181_v40 }
  0xe7   :  { %v372_v44 = vpop.eup %371  ;;  %383 = vtanh.f32 %v173_v42 }
  0xe8   :  { %v374_v45 = vpop.eup %373 }
  0xe9   :  { %v376_v46 = vpop.eup %375  ;;  %v197_v47 = vpack.c.bf16 %v374_v45, %v370_v43 }
  0xea   :  { %v196_v48 = vpack.c.bf16 %v376_v46, %v372_v44 }
  0xec   :  { %344 = vmatprep.subr.bf16.mxu1 %v196_v48 }
  0xed   :  { %345 = vmatpush3.bf16.msra.mxu1 %v196_v48 }
  0xee   :  { %v378_v49 = vpop.eup %377  ;;  %346 = vmatprep.subr.bf16.mxu1 %v197_v47 }
  0xef   :  { %v380_v50 = vpop.eup %379 }
  0xf0   :  { %v382_v51 = vpop.eup %381 }
  0xf1   :  { %v384_v52 = vpop.eup %383  ;;  %347 = vmatpush3.bf16.msra.mxu1 %v197_v47  ;;  %v199_v53 = vpack.c.bf16 %v382_v51, %v378_v49 }
  0xf2   :  { %v198_v54 = vpack.c.bf16 %v384_v52, %v380_v50 }
  0xf4   :  { %348 = vmatprep.subr.bf16.mxu1 %v198_v54 }
  0xf5   :  { %349 = vmatpush3.bf16.msra.mxu1 %v198_v54 }
  0xf6   :  { %350 = vmatprep.subr.bf16.mxu1 %v199_v53 }
  0xf9   :  { %351 = vmatpush3.bf16.msra.mxu1 %v199_v53 }
  0xfc   :  { %353 = vmatmul.mubr.msk.bf16.vlgmr.msra.gmra.mrb[0].mxu1 %vm234_vm1, %v368_v55 }
 0x1cf   :  { %v354_v59 = vpop.f32.mrb[0].mxu1 }
 0x1d0   :  { %v284_v60 = vadd.f32 %v354_v59, %v217_v58  ;;  %v275_v61 = vpop.f32.mrb[1].mxu1 }
 0x1d1   :  { %v276_v63 = vadd.f32 %v275_v61, %v207_v56  ;;  %v355_v0 = vpop.f32.mrb[2].mxu1 }
 0x1d2   :  { %292 = vst [vmem:[#allocation2 + $0x10] sm:$0xff] %v284_v60  ;;  %v287_v1 = vadd.f32 %v355_v0, %v222_v62  ;;  %v278_v2 = vpop.f32.mrb[3].mxu1 }
 0x1d3   :  { %290 = vst [vmem:[#allocation2] sm:$0xff] %v276_v63  ;;  %v279_v3 = vadd.f32 %v278_v2, %v212_v57 }
 0x1d4   :  { %293 = vst [vmem:[#allocation2 + $0x18] sm:$0xff] %v287_v1 }
 0x1d5   :  { %291 = vst [vmem:[#allocation2 + $0x8] sm:$0xff] %v279_v3 }
 0x1d6   :  { %396 = shalt.err (!%p393_p4)
}
 0x1d7   :  { %s397_s30 = scalar_lea.hbm %s523_s5, 512 }
 0x1d8   :  { %p398_p5 = scmp.ne.s32.totalorder %s523_s5, %s397_s30  ;;  %p401_p6 = scmp.lt.u32.totalorder %s397_s30, %s523_s5 }
 0x1da   :  { %p403_p7 = pnand %p401_p6, %p398_p5 }
 0x1dc   :  { %406 = shalt.err (!%p403_p7)
}
 0x1dd   :  { %s411_s10 = smov 128   ;;  %s412_s11 = smov 8  }
 0x1de   :  { %305 = dma.vmem_to_hbm [thread:$0]  %s300_s27, 512, %s523_s5, [#allocation3], %s411_s10, %s411_s10, %s412_s11  }
 0x1df   :  { %407 = dma.done.wait [#allocation3], 512  }
 0x1e0   :  { %408 = vsyncadd [#allocation3], 4294966784 }
 0x1e1   :  { %309 = vsyncpa [#allocation3], 1 }

</bundles_post_ra>
